<compile_context>
chip_gen: v7x
topology: tpu7x:2x2x1
jax: 0.10.0
libtpu: 0.0.40
codegen_flags: <defaults>
</compile_context>

<pallas_src>
import functools

import jax
import jax.numpy as jnp
from jax.experimental import pallas as pl
from jax.experimental.pallas import tpu as pltpu


def encoder_block_kernel(x_ref, w_ref, gb_ref, o_ref):
    # Linear (no bias -- cancelled by BN mean subtraction), bf16 x bf16 -> f32 on the MXU.
    y = jnp.dot(x_ref[...], w_ref[...], preferred_element_type=jnp.float32)  # (B, TN) f32

    # BatchNorm1d, training mode: batch statistics, biased variance, eps = 1e-5.
    # Single reduction pass in f32 (clamp guards tiny negative cancellation residue).
    inv_b = 1.0 / y.shape[0]                            # static Python float
    s = jnp.sum(y, axis=0, keepdims=True)               # (1, TN)
    ss = jnp.sum(y * y, axis=0, keepdims=True)          # (1, TN)
    mean = s * inv_b
    var = jnp.maximum(ss * inv_b - mean * mean, 0.0)

    gamma = gb_ref[0:1, :]                              # (1, TN)
    beta = gb_ref[1:2, :]                               # (1, TN)

    # Fold gamma into the rsqrt scale and beta/mean into one shift: one FMA per element.
    scale = gamma * jax.lax.rsqrt(var + 1e-5)           # rsqrt -> EUP slot
    shift = beta - mean * scale
    z = y * scale + shift                               # (B, TN)

    # LeakyReLU(0.2): mul + max (2 VALU ops/elem instead of cmp+mul+select).
    o_ref[...] = jnp.maximum(z, 0.2 * z).astype(o_ref.dtype)


def encoder_block(x, w_t, gamma, beta, *, block_n=None, out_dtype=jnp.float32):
    """x: (B, in_dim) f32; w_t: (in_dim, out_dim); gamma/beta: (1, out_dim) f32.

    The Linear bias is intentionally not an input: BatchNorm's batch-mean subtraction
    cancels any per-feature constant exactly, so the forward output is unchanged.
    """
    B, in_dim = x.shape
    out_dim = w_t.shape[1]

    # Lane-dense feature tiles: 128 for tiny layers, 256 default, 512 for wide layers
    # (256 -> 512 lane width measurably lifts HBM-roofline fraction on v6e/v7x).
    if block_n is None:
        if out_dim <= 128:
            block_n = 128
        elif out_dim <= 1024:
            block_n = 256
        else:
            block_n = 512
    out_pad = pl.cdiv(out_dim, block_n) * block_n

    def pad_feat(a):
        if out_pad == out_dim:
            return a
        return jnp.pad(a, ((0, 0), (0, out_pad - out_dim)))

    # Padded columns: W = 0, gamma = 0, beta = 0  ->  y = 0, var = 0, scale = 0,
    # output = 0 (no NaN/Inf); they are sliced away below.
    x_bf = x.astype(jnp.bfloat16)                       # bf16 operand for the MXU
    w_p = pad_feat(w_t).astype(jnp.bfloat16)            # bf16 weight stream
    gb_p = jnp.concatenate(
        [pad_feat(gamma).astype(jnp.float32), pad_feat(beta).astype(jnp.float32)],
        axis=0,
    )                                                   # (2, out_pad): one param stream

    grid = (out_pad // block_n,)
    out_bytes = jnp.dtype(out_dtype).itemsize

    # VMEM budget: every BlockSpec input is double-buffered (including the resident x),
    # plus slack; cap at ~80% of the physical per-core VMEM for compiler-scratch headroom
    # (~51 MiB on v7x's 64 MiB, ~102 MiB on v5e/v6e's 128 MiB).
    vmem_bytes = (
        2 * B * in_dim * 2                  # x (bf16), double-buffer accounted
        + 2 * in_dim * block_n * 2          # W tile (bf16), double-buffered
        + 2 * 2 * block_n * 4               # gamma/beta tile, double-buffered
        + 2 * B * block_n * out_bytes       # output tile, double-buffered
        + (2 << 20)                         # slack
    )
    try:
        phys_vmem = int(pltpu.get_tpu_info().vmem_capacity_bytes)
    except Exception:
        phys_vmem = 64 * 1024 * 1024        # conservative (v7x) fallback
    vmem_cap = int(phys_vmem * 0.8)
    vmem_bytes = int(min(max(vmem_bytes, 16 * 1024 * 1024), vmem_cap))

    cost = pl.CostEstimate(
        flops=2 * B * in_dim * out_pad + 9 * B * out_pad,
        transcendentals=out_pad,
        bytes_accessed=x_bf.size * 2 + w_p.size * 2 + gb_p.size * 4 + B * out_pad * out_bytes,
    )

    out = pl.pallas_call(
        encoder_block_kernel,
        out_shape=jax.ShapeDtypeStruct((B, out_pad), out_dtype),
        grid_spec=pltpu.PrefetchScalarGridSpec(
            num_scalar_prefetch=0,
            grid=grid,
            in_specs=[
                pl.BlockSpec((B, in_dim), lambda j: (0, 0)),        # x resident, no re-DMA
                pl.BlockSpec((in_dim, block_n), lambda j: (0, j)),  # stream bf16 W tiles
                pl.BlockSpec((2, block_n), lambda j: (0, j)),       # gamma/beta (one stream)
            ],
            out_specs=pl.BlockSpec((B, block_n), lambda j: (0, j)),
        ),
        compiler_params=pltpu.CompilerParams(
            dimension_semantics=("parallel",),   # feature tiles shard across v7x's 2 TCs
            vmem_limit_bytes=vmem_bytes,
        ),
        cost_estimate=cost,
    )(x_bf, w_p, gb_p)

    return out[:, :out_dim]


def init_params(key, in_dim, out_dim):
    """Deterministic synthetic parameters mimicking nn.Linear + nn.BatchNorm1d shapes."""
    k_w, k_b = jax.random.split(key)
    bound = 1.0 / jnp.sqrt(in_dim)
    # PyTorch Linear weight is (out_dim, in_dim); store transposed (in_dim, out_dim).
    w_t = jax.random.uniform(k_w, (in_dim, out_dim), jnp.float32, -bound, bound)
    bias = jax.random.uniform(k_b, (1, out_dim), jnp.float32, -bound, bound)
    gamma = jnp.ones((1, out_dim), jnp.float32)   # BatchNorm1d weight init
    beta = jnp.zeros((1, out_dim), jnp.float32)   # BatchNorm1d bias init
    return w_t, bias, gamma, beta


def reference(x, w_t, bias, gamma, beta):
    """Pure-JAX reference with the module's exact structure (bias INCLUDED; BN cancels it).

    Inputs are quantized to bf16 exactly as the kernel path does; everything else in f32.
    """
    xq = x.astype(jnp.bfloat16).astype(jnp.float32)
    wq = w_t.astype(jnp.bfloat16).astype(jnp.float32)
    y = jnp.dot(xq, wq, precision=jax.lax.Precision.HIGHEST) + bias
    mean = jnp.mean(y, axis=0, keepdims=True)
    var = jnp.mean((y - mean) ** 2, axis=0, keepdims=True)   # biased variance (training BN)
    z = (y - mean) / jnp.sqrt(var + 1e-5) * gamma + beta
    return jnp.where(z >= 0, z, 0.2 * z)


def _run_case(key, B, in_dim, out_dim):
    k_x, k_p = jax.random.split(key)
    x = jax.random.normal(k_x, (B, in_dim), jnp.float32)
    w_t, bias, gamma, beta = init_params(k_p, in_dim, out_dim)

    run = jax.jit(functools.partial(encoder_block))
    out = jax.block_until_ready(run(x, w_t, gamma, beta))
    ref = reference(x, w_t, bias, gamma, beta)

    assert out.shape == (B, out_dim), (out.shape, (B, out_dim))
    max_err = float(jnp.max(jnp.abs(out - ref)))
    assert jnp.allclose(out, ref, atol=5e-4, rtol=5e-4), max_err


if __name__ == "__main__":
    key = jax.random.PRNGKey(0)
    k0, k1 = jax.random.split(key)

    # Small shape matching the original toy test (out_dim padded 32 -> 128, grid=(1,)).
    _run_case(k0, B=8, in_dim=16, out_dim=32)
    # Larger shape exercising multiple feature tiles + padding (300 -> 384? no: 300 -> 2x128... )
    # out_dim=300 <= 1024 -> block_n=256, padded to 512, grid=(2,).
    _run_case(k1, B=16, in_dim=64, out_dim=300)

    print("KERNEL_OK")
</pallas_src>

<mosaic_0001>
module attributes {stable_mosaic.version = 11 : i64} {
  func.func @encoder_block_kernel(%arg0: i32, %arg1: memref<8x16xbf16, #tpu.memory_space<vmem>>, %arg2: memref<16x128xbf16, #tpu.memory_space<vmem>>, %arg3: memref<2x128xf32, #tpu.memory_space<vmem>>, %arg4: memref<8x128xf32, #tpu.memory_space<vmem>>) attributes {dimension_semantics = [#tpu.dimension_semantics<parallel>], iteration_bounds = array<i64: 1>, scalar_prefetch = 0 : i64, scratch_operands = 0 : i64, tpu.core_type = #tpu.core_type<tc>, window_params = [{pipeline_mode = #tpu.pipeline_mode<synchronous>, transform_indices = @transform_0, window_bounds = array<i64: 8, 16>}, {transform_indices = @transform_1, window_bounds = array<i64: 16, 128>}, {transform_indices = @transform_2, window_bounds = array<i64: 2, 128>}, {transform_indices = @transform_3, window_bounds = array<i64: 8, 128>}]} {
    %c0 = arith.constant 0 : index
    %c0_0 = arith.constant 0 : index
    %0 = vector.load %arg1[%c0, %c0_0] : memref<8x16xbf16, #tpu.memory_space<vmem>>, vector<8x16xbf16>
    %c0_1 = arith.constant 0 : index
    %c0_2 = arith.constant 0 : index
    %1 = vector.load %arg2[%c0_1, %c0_2] : memref<16x128xbf16, #tpu.memory_space<vmem>>, vector<16x128xbf16>
    %cst = arith.constant dense<0.000000e+00> : vector<8x128xf32>
    %2 = tpu.matmul %0, %1, %cst {dimension_numbers = #tpu.dot_dimension_numbers<[1], [0], [0], [1], [0, 0, 1, 1], [], []>} : vector<8x16xbf16>, vector<16x128xbf16>, vector<8x128xf32> -> vector<8x128xf32>
    %cst_3 = arith.constant dense<0.000000e+00> : vector<128xf32>
    %3 = vector.multi_reduction <add>, %2, %cst_3 [0] : vector<8x128xf32> to vector<128xf32>
    %4 = vector.shape_cast %3 : vector<128xf32> to vector<1x128xf32>
    %5 = arith.mulf %2, %2 : vector<8x128xf32>
    %cst_4 = arith.constant dense<0.000000e+00> : vector<128xf32>
    %6 = vector.multi_reduction <add>, %5, %cst_4 [0] : vector<8x128xf32> to vector<128xf32>
    %7 = vector.shape_cast %6 : vector<128xf32> to vector<1x128xf32>
    %cst_5 = arith.constant 1.250000e-01 : f32
    %8 = vector.broadcast %cst_5 : f32 to vector<1x128xf32>
    %9 = arith.mulf %4, %8 : vector<1x128xf32>
    %cst_6 = arith.constant 1.250000e-01 : f32
    %10 = vector.broadcast %cst_6 : f32 to vector<1x128xf32>
    %11 = arith.mulf %7, %10 : vector<1x128xf32>
    %12 = arith.mulf %9, %9 : vector<1x128xf32>
    %13 = arith.subf %11, %12 : vector<1x128xf32>
    %cst_7 = arith.constant 0.000000e+00 : f32
    %14 = vector.broadcast %cst_7 : f32 to vector<1x128xf32>
    %15 = arith.maximumf %13, %14 : vector<1x128xf32>
    %c0_8 = arith.constant 0 : index
    %c0_9 = arith.constant 0 : index
    %16 = vector.load %arg3[%c0_8, %c0_9] : memref<2x128xf32, #tpu.memory_space<vmem>>, vector<1x128xf32>
    %c1 = arith.constant 1 : index
    %c0_10 = arith.constant 0 : index
    %17 = vector.load %arg3[%c1, %c0_10] : memref<2x128xf32, #tpu.memory_space<vmem>>, vector<1x128xf32>
    %cst_11 = arith.constant 9.99999974E-6 : f32
    %18 = vector.broadcast %cst_11 : f32 to vector<1x128xf32>
    %19 = arith.addf %15, %18 : vector<1x128xf32>
    %20 = math.rsqrt %19 : vector<1x128xf32>
    %21 = arith.mulf %16, %20 : vector<1x128xf32>
    %22 = arith.mulf %9, %21 : vector<1x128xf32>
    %23 = arith.subf %17, %22 : vector<1x128xf32>
    %24 = vector.broadcast %21 : vector<1x128xf32> to vector<8x128xf32>
    %25 = arith.mulf %2, %24 : vector<8x128xf32>
    %26 = vector.broadcast %23 : vector<1x128xf32> to vector<8x128xf32>
    %27 = arith.addf %25, %26 : vector<8x128xf32>
    %cst_12 = arith.constant 2.000000e-01 : f32
    %28 = vector.broadcast %cst_12 : f32 to vector<8x128xf32>
    %29 = arith.mulf %28, %27 : vector<8x128xf32>
    %30 = arith.maximumf %27, %29 : vector<8x128xf32>
    %c0_13 = arith.constant 0 : index
    %c0_14 = arith.constant 0 : index
    %31 = vector.load %arg4[%c0_13, %c0_14] : memref<8x128xf32, #tpu.memory_space<vmem>>, vector<8x128xf32>
    tpu.vector_store %arg4[%c0_13, %c0_14], %30 {strides = array<i32>} : memref<8x128xf32, #tpu.memory_space<vmem>>, vector<8x128xf32>,
    return
  }
  func.func @transform_0(%arg0: i32) -> (i32, i32) {
    %c0_i32 = arith.constant 0 : i32
    %c0_i32_0 = arith.constant 0 : i32
    %c0_i32_1 = arith.constant 0 : i32
    return %c0_i32, %c0_i32_0 : i32, i32
  }
  func.func @transform_1(%arg0: i32) -> (i32, i32) {
    %c0_i32 = arith.constant 0 : i32
    %c0_i32_0 = arith.constant 0 : i32
    return %c0_i32, %arg0 : i32, i32
  }
  func.func @transform_2(%arg0: i32) -> (i32, i32) {
    %c0_i32 = arith.constant 0 : i32
    %c0_i32_0 = arith.constant 0 : i32
    return %c0_i32, %arg0 : i32, i32
  }
  func.func @transform_3(%arg0: i32) -> (i32, i32) {
    %c0_i32 = arith.constant 0 : i32
    %c0_i32_0 = arith.constant 0 : i32
    return %c0_i32, %arg0 : i32, i32
  }
}

</mosaic_0001>

<bundles_post_ra>
// kernel: encoder_block.1
= control target key start
LH: loop header
LB: loop body
LE: loop exit
PB: predicated region body
PF: predicated region fallthrough
CT: control target
= control target key end

     0   :  { %v161_v1 = vmov 0.0   ;;  %s208_s0 = inlined_call_operand.vmem [shape: bf16[8,16], index: 0, kind: input, shape index: {}]   ;;  %s209_s1 = inlined_call_operand.vmem [shape: bf16[16,128], index: 1, kind: input, shape index: {}]   ;;  %s210_s2 = inlined_call_operand.vmem [shape: f32[2,128], index: 2, kind: input, shape index: {}]   ;;  %s211_s3 = inlined_call_operand.hbm [shape: f32[8,128], index: 3, kind: output, shape index: {}]  }
   0x1   :  { %v134_v0 = vld [vmem:[%s209_s1] sm:$0xff]   ;;  %125 = vmatprep.subr.bf16.mxu0 %v161_v1 }
   0x2   :  { %8 = vsyncpa [#allocation3], 0  ;;  %126 = vmatpush3.bf16.msra.mxu0 %v134_v0  ;;  %vm162_vm0 = vmmov 0   ;;  %v16_v2 = vld [vmem:[%s208_s0] sm:$0xf]  ;;  %vm25_vm1 = vcmask 130048   ;;  %v94_v26 = vlaneseq }
   0x3   :  { %127 = vmatprep.mubr.msk.bf16.mxu0 %vm162_vm0, %v161_v1  ;;  %v87_v28 = vld [vmem:[%s210_s2] sm:$0x1]  ;;  %v88_v32 = vld [vmem:[%s210_s2 + $0x1] sm:$0x1]  ;;  %s163_s18 = smov [#allocation2]  }
   0x4   :  { %v95_v27 = vshrl.u32 %v94_v26, 7  ;;  %s113_s19 = sshll.u32 %s163_s18, 4  ;;  %s114_s19 = int_to_ptr.vmem [resolvable:$true] %s113_s19 }
   0x5   :  { %128 = vmatmul.mubr.msk.bf16.vlgmr.msra.gmra.mrb[0].mxu0 %vm25_vm1, %v16_v2  ;;  %s137_s20 = scalar_lea.vmem %s114_s19, 128  ;;  %p142_p1 = scmp.lt.s32.totalorder %s114_s19, %s114_s19 }
   0x6   :  { %v96_v29 = vsub.s32 0, %v95_v27  ;;  %p138_p0 = scmp.ne.s32.totalorder %s114_s19, %s137_s20  ;;  %p143_p2 = scmp.lt.s32.totalorder %s137_s20, %s137_s20 }
   0x8   :  { %p144_p3 = por %p143_p2, %p142_p1 }
   0xa   :  { %p145_p4 = pnand %p144_p3, %p138_p0 }
  0xd8   :  { %v63_v3 = vpop.f32.mrb[0].mxu0 }
  0xd9   :  { %v69_v4 = vrot.slane %v63_v3, 4  ;;  %v75_v5 = vmul.f32 %v63_v3, %v63_v3  ;;  %v129_v6 = vpop.f32.mrb[1].mxu0 }
  0xda   :  { %v66_v7 = vpop.f32.mrb[2].mxu0 }
  0xdb   :  { %v70_v8 = vadd.f32 %v69_v4, %v63_v3  ;;  %v76_v9 = vrot.slane %v75_v5, 4  ;;  %v130_v10 = vpop.f32.mrb[3].mxu0 }
  0xdd   :  { %v71_v11 = vrot.slane %v70_v8, 2  ;;  %v77_v12 = vadd.f32 %v76_v9, %v75_v5 }
  0xdf   :  { %v72_v13 = vadd.f32 %v71_v11, %v70_v8  ;;  %v78_v14 = vrot.slane %v77_v12, 2 }
  0xe1   :  { %v73_v15 = vrot.slane %v72_v13, 1  ;;  %v79_v16 = vadd.f32 %v78_v14, %v77_v12 }
  0xe3   :  { %v74_v17 = vadd.f32 %v73_v15, %v72_v13  ;;  %v80_v18 = vrot.slane %v79_v16, 1 }
  0xe5   :  { %v81_v19 = vadd.f32 %v80_v18, %v79_v16  ;;  %v82_v20 = vmul.f32 0.125, %v74_v17 }
  0xe7   :  { %v83_v21 = vmul.f32 0.125, %v81_v19  ;;  %v84_v22 = vmul.f32 %v82_v20, %v82_v20 }
  0xe9   :  { %v85_v23 = vsub.f32 %v83_v21, %v84_v22 }
  0xeb   :  { %v86_v24 = vmax.f32 %v85_v23, 0.0 }
  0xed   :  { %v89_v25 = vadd.f32 1e-05, %v86_v24 }
  0xef   :  { %135 = vrsqrt.f32 %v89_v25 }
  0xf9   :  { %v136_v30 = vpop.eup %135 }
  0xfa   :  { %v91_v31 = vmul.f32 %v136_v30, %v87_v28 }
  0xfc   :  { %v97_v33 = vrot.slane %v91_v31, %v96_v29  ;;  %v92_v34 = vmul.f32 %v91_v31, %v82_v20 }
  0xfe   :  { %v93_v35 = vsub.f32 %v88_v32, %v92_v34  ;;  %v98_v36 = vmul.f32 %v97_v33, %v63_v3 }
 0x100   :  { %v102_v37 = vrot.slane %v93_v35, %v96_v29 }
 0x102   :  { %v103_v38 = vadd.f32 %v102_v37, %v98_v36 }
 0x104   :  { %v104_v39 = vmul.f32 0.2, %v103_v38 }
 0x106   :  { %v105_v40 = vmax.f32 %v103_v38, %v104_v39 }
 0x108   :  { %106 = vst [vmem:[#allocation2] sm:$0xff] %v105_v40 }
 0x109   :  { %148 = shalt.err (!%p145_p4)
}
 0x10a   :  { %s149_s22 = scalar_lea.hbm %s211_s3, 128 }
 0x10b   :  { %p150_p5 = scmp.ne.s32.totalorder %s211_s3, %s149_s22  ;;  %p153_p6 = scmp.lt.u32.totalorder %s149_s22, %s211_s3 }
 0x10d   :  { %p155_p7 = pnand %p153_p6, %p150_p5 }
 0x10f   :  { %158 = shalt.err (!%p155_p7)
}
 0x110   :  { %116 = dma.vmem_to_hbm [thread:$0]  %s114_s19, 128, %s211_s3, [#allocation3]  }
 0x111   :  { %159 = dma.done.wait [#allocation3], 128  }
 0x112   :  { %160 = vsyncadd [#allocation3], 4294967168 }
 0x113   :  { %120 = vsyncpa [#allocation3], 1 }

</bundles_post_ra>
